<compile_context>
chip_gen: v5e
topology: v5e:2x2
jax: 0.10.0
libtpu: 0.0.40
codegen_flags: <defaults>
</compile_context>

<pallas_src>
import functools

import jax
import jax.numpy as jnp
from jax.experimental import pallas as pl
from jax.experimental.pallas import tpu as pltpu


def _context_attention_kernel(x_ref, wt_ref, b_ref, gc_ref, o_ref, *, head_size_one):
    # x_ref : (TB, T, S)  bf16  TB sequences of the batch
    # wt_ref: (S, S)      bf16  attention_net weight, transposed (in -> out)
    # b_ref : (1, S)      f32   attention_net bias
    # gc_ref: (S, S)      f32   fused head-mixing matrix  Gc = diag(cv) @ (G @ G^T)
    # o_ref : (TB, S)     f32   output slab for these TB batches
    TB, T, S = x_ref.shape

    xb = x_ref[...]                                   # (TB, T, S) bf16
    x2 = xb.reshape(TB * T, S)                        # pack M dim for the MXU (trivial reshape)

    # Linear: bf16 MXU matmul, f32 accumulation, f32 bias add
    a = jnp.dot(x2, wt_ref[...], preferred_element_type=jnp.float32) + b_ref[...]  # (TB*T, S)

    if head_size_one:
        # PyTorch else-branch: softmax of the raw Linear output (no tanh, no heads).
        sim = a
    else:
        # Fused per-head similarity, already broadcast back to every channel of its head:
        #   sim[m, c] = sum_d tanh(a)[m, head(c)*hs + d] * cv[head(c), d]
        # f32 matmul on purpose (keeps the context vector un-rounded pre-softmax).
        sim = jnp.dot(jnp.tanh(a), gc_ref[...], preferred_element_type=jnp.float32)

    sim3 = sim.reshape(TB, T, S)                      # trivial reshape (last dim unchanged)

    # softmax over the sequence axis (per batch; identical within each head's channels)
    m = jnp.max(sim3, axis=1, keepdims=True)          # (TB, 1, S)
    e = jnp.exp(sim3 - m)
    inv = pl.reciprocal(jnp.sum(e, axis=1, keepdims=True), approx=True)
    w = e * inv                                       # (TB, T, S)

    # weight x with the per-head softmax weights and reduce over T
    xf = xb.astype(jnp.float32)                       # upcast only for the weighted sum
    out = jnp.sum(w * xf, axis=1)                     # (TB, S)
    o_ref[...] = out.astype(o_ref.dtype)


def _select_tb(B, T, S):
    """Largest divisor of B such that the per-step VMEM working set fits a v7x-safe
    budget and (when B >= 2) at least two grid steps remain for the two v7x
    TensorCores.  On v5e/v6e with large B this automatically grows TB*T into the
    256-512 range, filling the MXU M dimension and amortizing per-step overhead."""
    budget = 20 * 1024 * 1024          # < v7x's 32 MiB default scoped VMEM, with headroom

    def vmem_need(tb):
        m = tb * T
        x_blk = m * S * 2 * 2                       # bf16 x block, double-buffered
        out_blk = tb * S * 4 * 2                    # f32 out block, double-buffered
        interm = 3 * m * S * 4                      # a/tanh, sim/softmax, f32 x copy
        invariants = 2 * (S * S * 2 + S * 4 + S * S * 4)   # W^T + bias + Gc (worst case x2)
        return x_blk + out_blk + interm + invariants

    for tb in range(B, 0, -1):
        if B % tb != 0:
            continue
        if B >= 2 and tb > B // 2:                  # keep grid length >= 2 (megacore)
            continue
        if vmem_need(tb) <= budget:
            return tb
    return 1


def context_attention(x, weight, bias, context_vector, num_head):
    """x: (B, T, S); weight: (S, S) (torch layout, out x in); bias: (S,);
    context_vector: (num_head, head_size, 1).  Returns (B, S) f32."""
    B, T, S = x.shape
    if S % num_head != 0:
        raise ValueError("size must be dividable by num_head", S, num_head)
    head_size = S // num_head

    # Stream x as bf16 (halves the dominant HBM traffic). Ideally the caller already
    # holds x in bf16; the cast here is a one-off wrapper op for the f32 demo input.
    x_bf = x if x.dtype == jnp.bfloat16 else x.astype(jnp.bfloat16)
    wt = weight.T.astype(jnp.bfloat16)                 # (S_in, S_out), bf16 for MXU
    b2 = bias.reshape(1, S).astype(jnp.float32)

    if head_size != 1:
        # Fused head-mixing matrix: Gc[c, c'] = cv[c] if head(c) == head(c') else 0.
        cv_flat = context_vector.reshape(S).astype(jnp.float32)   # head-major flatten
        col_head = jnp.arange(S, dtype=jnp.int32) // head_size
        same_head = col_head[:, None] == col_head[None, :]
        gc = jnp.where(same_head, cv_flat[:, None], 0.0).astype(jnp.float32)
    else:
        gc = jnp.zeros((S, S), jnp.float32)            # unused in this branch

    tb = _select_tb(B, T, S)
    grid = (B // tb,)

    kernel = functools.partial(_context_attention_kernel,
                               head_size_one=(head_size == 1))

    def make_invariant_spec(shape, single_buffer):
        if single_buffer:
            return pl.BlockSpec(shape, lambda i: (0,) * len(shape),
                                pipeline_mode=pl.Buffered(1))
        return pl.BlockSpec(shape, lambda i: (0,) * len(shape))

    def run(single_buffer_invariants):
        in_specs = [
            pl.BlockSpec((tb, T, S), lambda i: (i, 0, 0)),           # x: TB sequences / step
            make_invariant_spec((S, S), single_buffer_invariants),   # W^T (bf16)
            make_invariant_spec((1, S), single_buffer_invariants),   # bias
            make_invariant_spec((S, S), single_buffer_invariants),   # Gc
        ]
        return pl.pallas_call(
            kernel,
            out_shape=jax.ShapeDtypeStruct((B, S), jnp.float32),
            grid=grid,
            in_specs=in_specs,
            out_specs=pl.BlockSpec((tb, S), lambda i: (i, 0)),
            compiler_params=pltpu.CompilerParams(
                dimension_semantics=("parallel",),
                vmem_limit_bytes=32 * 1024 * 1024,    # safe on v5e/v6e/v7x physical VMEM
            ),
        )(x_bf, wt, b2, gc)

    try:
        # Preferred: single-buffer the grid-invariant operands (second pipeline buffer
        # is pure VMEM waste for a constant index_map).
        return run(single_buffer_invariants=True)
    except Exception:
        # This JAX/Mosaic build does not accept pipeline_mode on a top-level
        # pallas_call BlockSpec -> fall back to default double buffering (correct,
        # slightly more VMEM for the invariant operands).
        return run(single_buffer_invariants=False)


def context_attention_ref(x, weight, bias, context_vector, num_head):
    """Pure-JAX f32 reference mirroring the PyTorch forward (both branches)."""
    B, T, S = x.shape
    hs = S // num_head
    a = jnp.einsum("bts,os->bto", x, weight) + bias                  # Linear
    if hs != 1:
        t4 = jnp.tanh(a).reshape(B, T, num_head, hs)
        cv = context_vector.reshape(num_head, hs)
        sim = jnp.einsum("bthd,hd->bth", t4, cv)                     # (B, T, H)
        w = jax.nn.softmax(sim, axis=1)                              # softmax over T
        x4 = x.reshape(B, T, num_head, hs)
        out = jnp.einsum("bth,bthd->bhd", w, x4).reshape(B, S)
    else:
        w = jax.nn.softmax(a, axis=1)
        out = jnp.sum(w * x, axis=1)
    return out


if __name__ == "__main__":
    key = jax.random.PRNGKey(0)
    kx, kw, kb, kc = jax.random.split(key, 4)

    # ---- multi-head path (head_size != 1) ----
    B, T, S, H = 16, 8, 32, 4                                        # head_size = 8
    x = jax.random.normal(kx, (B, T, S), dtype=jnp.float32)
    bound = 1.0 / jnp.sqrt(S)
    weight = jax.random.uniform(kw, (S, S), minval=-bound, maxval=bound, dtype=jnp.float32)
    bias = jax.random.uniform(kb, (S,), minval=-bound, maxval=bound, dtype=jnp.float32)
    context_vector = jax.random.uniform(kc, (H, S // H, 1), minval=-1.0, maxval=1.0,
                                        dtype=jnp.float32)

    out = jax.block_until_ready(context_attention(x, weight, bias, context_vector, H))
    ref = context_attention_ref(x, weight, bias, context_vector, H)
    assert out.shape == (B, S)
    max_err = float(jnp.max(jnp.abs(out - ref)))
    # bf16 x / W^T matmul + approx reciprocal -> loosened tolerance vs. the f32 reference
    assert max_err < 2e-2, max_err

    # ---- head_size == 1 path (softmax of the raw Linear output) ----
    H1 = S
    context_vector1 = jax.random.uniform(kc, (H1, 1, 1), minval=-1.0, maxval=1.0,
                                         dtype=jnp.float32)
    out1 = jax.block_until_ready(context_attention(x, weight, bias, context_vector1, H1))
    ref1 = context_attention_ref(x, weight, bias, context_vector1, H1)
    assert out1.shape == (B, S)
    max_err1 = float(jnp.max(jnp.abs(out1 - ref1)))
    assert max_err1 < 2e-2, max_err1

    print("KERNEL_OK")
</pallas_src>

<mosaic_0001>
module attributes {stable_mosaic.version = 11 : i64} {
  func.func @_context_attention_kernel(%arg0: i32, %arg1: memref<8x8x32xbf16, #tpu.memory_space<vmem>>, %arg2: memref<32x32xbf16, #tpu.memory_space<vmem>>, %arg3: memref<1x32xf32, #tpu.memory_space<vmem>>, %arg4: memref<32x32xf32, #tpu.memory_space<vmem>>, %arg5: memref<8x32xf32, #tpu.memory_space<vmem>>) attributes {dimension_semantics = [#tpu.dimension_semantics<parallel>], iteration_bounds = array<i64: 2>, scalar_prefetch = 0 : i64, scratch_operands = 0 : i64, tpu.core_type = #tpu.core_type<tc>, window_params = [{transform_indices = @transform_0, window_bounds = array<i64: 8, 8, 32>}, {pipeline_mode = #tpu.pipeline_mode<synchronous>, transform_indices = @transform_1, window_bounds = array<i64: 32, 32>}, {pipeline_mode = #tpu.pipeline_mode<synchronous>, transform_indices = @transform_2, window_bounds = array<i64: 1, 32>}, {pipeline_mode = #tpu.pipeline_mode<synchronous>, transform_indices = @transform_3, window_bounds = array<i64: 32, 32>}, {transform_indices = @transform_4, window_bounds = array<i64: 8, 32>}]} {
    %c0 = arith.constant 0 : index
    %c0_0 = arith.constant 0 : index
    %c0_1 = arith.constant 0 : index
    %0 = vector.load %arg1[%c0, %c0_0, %c0_1] : memref<8x8x32xbf16, #tpu.memory_space<vmem>>, vector<8x8x32xbf16>
    %1 = vector.shape_cast %0 : vector<8x8x32xbf16> to vector<64x32xbf16>
    %c0_2 = arith.constant 0 : index
    %c0_3 = arith.constant 0 : index
    %2 = vector.load %arg2[%c0_2, %c0_3] : memref<32x32xbf16, #tpu.memory_space<vmem>>, vector<32x32xbf16>
    %cst = arith.constant dense<0.000000e+00> : vector<64x32xf32>
    %3 = tpu.matmul %1, %2, %cst {dimension_numbers = #tpu.dot_dimension_numbers<[1], [0], [0], [1], [0, 0, 1, 1], [], []>} : vector<64x32xbf16>, vector<32x32xbf16>, vector<64x32xf32> -> vector<64x32xf32>
    %c0_4 = arith.constant 0 : index
    %c0_5 = arith.constant 0 : index
    %4 = vector.load %arg3[%c0_4, %c0_5] : memref<1x32xf32, #tpu.memory_space<vmem>>, vector<1x32xf32>
    %5 = vector.broadcast %4 : vector<1x32xf32> to vector<64x32xf32>
    %6 = arith.addf %3, %5 : vector<64x32xf32>
    %7 = math.tanh %6 : vector<64x32xf32>
    %c0_6 = arith.constant 0 : index
    %c0_7 = arith.constant 0 : index
    %8 = vector.load %arg4[%c0_6, %c0_7] : memref<32x32xf32, #tpu.memory_space<vmem>>, vector<32x32xf32>
    %cst_8 = arith.constant dense<0.000000e+00> : vector<64x32xf32>
    %9 = tpu.matmul %7, %8, %cst_8 {dimension_numbers = #tpu.dot_dimension_numbers<[1], [0], [0], [1], [0, 0, 1, 1], [], []>} : vector<64x32xf32>, vector<32x32xf32>, vector<64x32xf32> -> vector<64x32xf32>
    %10 = vector.shape_cast %9 : vector<64x32xf32> to vector<8x8x32xf32>
    %cst_9 = arith.constant dense<0xFF800000> : vector<8x32xf32>
    %11 = vector.multi_reduction <maximumf>, %10, %cst_9 [1] : vector<8x8x32xf32> to vector<8x32xf32>
    %12 = vector.shape_cast %11 : vector<8x32xf32> to vector<8x1x32xf32>
    %13 = vector.broadcast %12 : vector<8x1x32xf32> to vector<8x8x32xf32>
    %14 = arith.subf %10, %13 : vector<8x8x32xf32>
    %15 = math.exp %14 : vector<8x8x32xf32>
    %cst_10 = arith.constant dense<0.000000e+00> : vector<8x32xf32>
    %16 = vector.multi_reduction <add>, %15, %cst_10 [1] : vector<8x8x32xf32> to vector<8x32xf32>
    %17 = vector.shape_cast %16 : vector<8x32xf32> to vector<8x1x32xf32>
    %18 = tpu.reciprocal %17 {approx = true} : vector<8x1x32xf32> -> vector<8x1x32xf32>
    %19 = vector.broadcast %18 : vector<8x1x32xf32> to vector<8x8x32xf32>
    %20 = arith.mulf %15, %19 : vector<8x8x32xf32>
    %21 = arith.extf %0 : vector<8x8x32xbf16> to vector<8x8x32xf32>
    %22 = arith.mulf %20, %21 : vector<8x8x32xf32>
    %cst_11 = arith.constant dense<0.000000e+00> : vector<8x32xf32>
    %23 = vector.multi_reduction <add>, %22, %cst_11 [1] : vector<8x8x32xf32> to vector<8x32xf32>
    %c0_12 = arith.constant 0 : index
    %c0_13 = arith.constant 0 : index
    %24 = vector.load %arg5[%c0_12, %c0_13] : memref<8x32xf32, #tpu.memory_space<vmem>>, vector<8x32xf32>
    tpu.vector_store %arg5[%c0_12, %c0_13], %23 {strides = array<i32>} : memref<8x32xf32, #tpu.memory_space<vmem>>, vector<8x32xf32>,
    return
  }
  func.func @transform_0(%arg0: i32) -> (i32, i32, i32) {
    %c0_i32 = arith.constant 0 : i32
    %c0_i32_0 = arith.constant 0 : i32
    %c0_i32_1 = arith.constant 0 : i32
    return %arg0, %c0_i32, %c0_i32_0 : i32, i32, i32
  }
  func.func @transform_1(%arg0: i32) -> (i32, i32) {
    %c0_i32 = arith.constant 0 : i32
    %c0_i32_0 = arith.constant 0 : i32
    %c0_i32_1 = arith.constant 0 : i32
    return %c0_i32, %c0_i32_0 : i32, i32
  }
  func.func @transform_2(%arg0: i32) -> (i32, i32) {
    %c0_i32 = arith.constant 0 : i32
    %c0_i32_0 = arith.constant 0 : i32
    %c0_i32_1 = arith.constant 0 : i32
    return %c0_i32, %c0_i32_0 : i32, i32
  }
  func.func @transform_3(%arg0: i32) -> (i32, i32) {
    %c0_i32 = arith.constant 0 : i32
    %c0_i32_0 = arith.constant 0 : i32
    %c0_i32_1 = arith.constant 0 : i32
    return %c0_i32, %c0_i32_0 : i32, i32
  }
  func.func @transform_4(%arg0: i32) -> (i32, i32) {
    %c0_i32 = arith.constant 0 : i32
    %c0_i32_0 = arith.constant 0 : i32
    return %arg0, %c0_i32 : i32, i32
  }
}

module attributes {stable_mosaic.version = 11 : i64} {
  func.func @_context_attention_kernel(%arg0: i32, %arg1: memref<8x8x32xbf16, #tpu.memory_space<vmem>>, %arg2: memref<32x32xbf16, #tpu.memory_space<vmem>>, %arg3: memref<1x32xf32, #tpu.memory_space<vmem>>, %arg4: memref<32x32xf32, #tpu.memory_space<vmem>>, %arg5: memref<8x32xf32, #tpu.memory_space<vmem>>) attributes {dimension_semantics = [#tpu.dimension_semantics<parallel>], iteration_bounds = array<i64: 2>, scalar_prefetch = 0 : i64, scratch_operands = 0 : i64, tpu.core_type = #tpu.core_type<tc>, window_params = [{transform_indices = @transform_0, window_bounds = array<i64: 8, 8, 32>}, {pipeline_mode = #tpu.pipeline_mode<synchronous>, transform_indices = @transform_1, window_bounds = array<i64: 32, 32>}, {pipeline_mode = #tpu.pipeline_mode<synchronous>, transform_indices = @transform_2, window_bounds = array<i64: 1, 32>}, {pipeline_mode = #tpu.pipeline_mode<synchronous>, transform_indices = @transform_3, window_bounds = array<i64: 32, 32>}, {transform_indices = @transform_4, window_bounds = array<i64: 8, 32>}]} {
    %c0 = arith.constant 0 : index
    %c0_0 = arith.constant 0 : index
    %c0_1 = arith.constant 0 : index
    %0 = vector.load %arg1[%c0, %c0_0, %c0_1] : memref<8x8x32xbf16, #tpu.memory_space<vmem>>, vector<8x8x32xbf16>
    %1 = vector.shape_cast %0 : vector<8x8x32xbf16> to vector<64x32xbf16>
    %c0_2 = arith.constant 0 : index
    %c0_3 = arith.constant 0 : index
    %2 = vector.load %arg2[%c0_2, %c0_3] : memref<32x32xbf16, #tpu.memory_space<vmem>>, vector<32x32xbf16>
    %cst = arith.constant dense<0.000000e+00> : vector<64x32xf32>
    %3 = tpu.matmul %1, %2, %cst {dimension_numbers = #tpu.dot_dimension_numbers<[1], [0], [0], [1], [0, 0, 1, 1], [], []>} : vector<64x32xbf16>, vector<32x32xbf16>, vector<64x32xf32> -> vector<64x32xf32>
    %c0_4 = arith.constant 0 : index
    %c0_5 = arith.constant 0 : index
    %4 = vector.load %arg3[%c0_4, %c0_5] : memref<1x32xf32, #tpu.memory_space<vmem>>, vector<1x32xf32>
    %5 = vector.broadcast %4 : vector<1x32xf32> to vector<64x32xf32>
    %6 = arith.addf %3, %5 : vector<64x32xf32>
    %7 = math.tanh %6 : vector<64x32xf32>
    %c0_6 = arith.constant 0 : index
    %c0_7 = arith.constant 0 : index
    %8 = vector.load %arg4[%c0_6, %c0_7] : memref<32x32xf32, #tpu.memory_space<vmem>>, vector<32x32xf32>
    %cst_8 = arith.constant dense<0.000000e+00> : vector<64x32xf32>
    %9 = tpu.matmul %7, %8, %cst_8 {dimension_numbers = #tpu.dot_dimension_numbers<[1], [0], [0], [1], [0, 0, 1, 1], [], []>} : vector<64x32xf32>, vector<32x32xf32>, vector<64x32xf32> -> vector<64x32xf32>
    %10 = vector.shape_cast %9 : vector<64x32xf32> to vector<8x8x32xf32>
    %cst_9 = arith.constant dense<0xFF800000> : vector<8x32xf32>
    %11 = vector.multi_reduction <maximumf>, %10, %cst_9 [1] : vector<8x8x32xf32> to vector<8x32xf32>
    %12 = vector.shape_cast %11 : vector<8x32xf32> to vector<8x1x32xf32>
    %13 = vector.broadcast %12 : vector<8x1x32xf32> to vector<8x8x32xf32>
    %14 = arith.subf %10, %13 : vector<8x8x32xf32>
    %15 = math.exp %14 : vector<8x8x32xf32>
    %cst_10 = arith.constant dense<0.000000e+00> : vector<8x32xf32>
    %16 = vector.multi_reduction <add>, %15, %cst_10 [1] : vector<8x8x32xf32> to vector<8x32xf32>
    %17 = vector.shape_cast %16 : vector<8x32xf32> to vector<8x1x32xf32>
    %18 = tpu.reciprocal %17 {approx = true} : vector<8x1x32xf32> -> vector<8x1x32xf32>
    %19 = vector.broadcast %18 : vector<8x1x32xf32> to vector<8x8x32xf32>
    %20 = arith.mulf %15, %19 : vector<8x8x32xf32>
    %21 = arith.extf %0 : vector<8x8x32xbf16> to vector<8x8x32xf32>
    %22 = arith.mulf %20, %21 : vector<8x8x32xf32>
    %cst_11 = arith.constant dense<0.000000e+00> : vector<8x32xf32>
    %23 = vector.multi_reduction <add>, %22, %cst_11 [1] : vector<8x8x32xf32> to vector<8x32xf32>
    %c0_12 = arith.constant 0 : index
    %c0_13 = arith.constant 0 : index
    %24 = vector.load %arg5[%c0_12, %c0_13] : memref<8x32xf32, #tpu.memory_space<vmem>>, vector<8x32xf32>
    tpu.vector_store %arg5[%c0_12, %c0_13], %23 {strides = array<i32>} : memref<8x32xf32, #tpu.memory_space<vmem>>, vector<8x32xf32>,
    return
  }
  func.func @transform_0(%arg0: i32) -> (i32, i32, i32) {
    %c0_i32 = arith.constant 0 : i32
    %c0_i32_0 = arith.constant 0 : i32
    %c0_i32_1 = arith.constant 0 : i32
    return %arg0, %c0_i32, %c0_i32_0 : i32, i32, i32
  }
  func.func @transform_1(%arg0: i32) -> (i32, i32) {
    %c0_i32 = arith.constant 0 : i32
    %c0_i32_0 = arith.constant 0 : i32
    %c0_i32_1 = arith.constant 0 : i32
    return %c0_i32, %c0_i32_0 : i32, i32
  }
  func.func @transform_2(%arg0: i32) -> (i32, i32) {
    %c0_i32 = arith.constant 0 : i32
    %c0_i32_0 = arith.constant 0 : i32
    %c0_i32_1 = arith.constant 0 : i32
    return %c0_i32, %c0_i32_0 : i32, i32
  }
  func.func @transform_3(%arg0: i32) -> (i32, i32) {
    %c0_i32 = arith.constant 0 : i32
    %c0_i32_0 = arith.constant 0 : i32
    %c0_i32_1 = arith.constant 0 : i32
    return %c0_i32, %c0_i32_0 : i32, i32
  }
  func.func @transform_4(%arg0: i32) -> (i32, i32) {
    %c0_i32 = arith.constant 0 : i32
    %c0_i32_0 = arith.constant 0 : i32
    return %arg0, %c0_i32 : i32, i32
  }
}

</mosaic_0001>

<bundles_post_ra>
// kernel: tpu_custom_call.1
= control target key start
LH: loop header
LB: loop body
LE: loop exit
PB: predicated region body
PF: predicated region fallthrough
CT: control target
= control target key end

     0   :  { %9 = vsyncpa [#allocation3], 0  ;;  %s1386_s0 = inlined_call_operand.hbm [shape: bf16[16,8,32], index: 0, kind: input, shape index: {}]   ;;  %s1387_s1 = inlined_call_operand.hbm [shape: bf16[32,32], index: 1, kind: input, shape index: {}]   ;;  %s1388_s2 = inlined_call_operand.vmem [shape: f32[1,32], index: 2, kind: input, shape index: {}]   ;;  %s1389_s3 = inlined_call_operand.hbm [shape: f32[32,32], index: 3, kind: input, shape index: {}]   ;;  %s1390_s4 = inlined_call_operand.hbm [shape: f32[16,32], index: 4, kind: output, shape index: {}]  }
   0x1   :  { %11 = vsyncpa [#allocation3 + $0x1], 0 }
   0x2   :  { %12 = vsyncpa [#allocation6], 0 }
   0x3   :  { %13 = vsyncpa [#allocation4], 0 }
   0x4   :  { %15 = vsyncpa [#allocation4 + $0x1], 0  ;;  %s1152_s15 = smov 0   ;;  %s1154_s16 = smov 0  }
   0x5   :  { %s1156_s17 = smov 0   ;;  %s1158_s18 = smov 0  }
   0x6 LB: > { %s1173_s19 = sadd.s32 4294967295, %s1119_s18   ;;  %s773_s20 = sadd.s32 4294967294, %s1119_s18   ;;  %s1119_s18 = sphi %s1158_s18, %s1400_s18   ;;  %s1115_s17 = sphi %s1156_s17, %s1399_s17   ;;  %s1111_s16 = sphi %s1154_s16, %s1398_s16   ;;  %s1107_s15 = sphi %s1152_s15, %s1397_s15  }
   0x7   : > { %p41_p0 = scmp.ne.s32.totalorder %s1111_s16, %s1107_s15  ;;  %p42_p1 = scmp.eq.s32.totalorder %s1173_s19, 0 }
   0x8   : > { %p128_p2 = scmp.eq.s32.totalorder %s1173_s19, 1  ;;  %p134_p3 = scmp.eq.s32.totalorder %s773_s20, 1 }
   0x9   : > { %p1182_p4 = por %p42_p1, %p41_p0  ;;  %p774_p5 = scmp.ge.s32.totalorder %s1119_s18, 1 }
   0xa   : > { %p1187_p6 = por %p134_p3, %p41_p0  ;;  %p141_p7 = scmp.lt.s32.totalorder %s1119_s18, 3 }
   0xb   : > { %s152_s25 = sshll.u32 %s1387_s1, 4  ;;  %s1121_s27 = smov [#allocation5]   ;;  %s153_s25 = int_to_ptr.hbm [resolvable:$true] %s152_s25 }
   0xc   : > { %p1195_p8 = pnand %p774_p5, %p141_p7  ;;  %s154_s28 = sshll.u32 %s1121_s27, 4  ;;  %s155_s28 = int_to_ptr.vmem [resolvable:$true] %s154_s28 }
   0xd   : > { %s169_s5 = sshll.u32 %s1389_s3, 4  ;;  %s1122_s6 = smov 64   ;;  %s170_s5 = int_to_ptr.hbm [resolvable:$true] %s169_s5 }
   0xe   : > { %p851_p9 = pneg %p1195_p8  ;;  %s1123_s7 = smov 4  }
   0xf   : > { %s1124_s8 = smov [#allocation7]   ;;  %s1125_s10 = smov 128  }
  0x10   : > { %p852_p10 = pnand %p851_p9, %p42_p1  ;;  %s171_s9 = sshll.u32 %s1124_s8, 4  ;;  %s172_s9 = int_to_ptr.vmem [resolvable:$true] %s171_s9 }
  0x11   : > { %s1126_s11 = smov 8   ;;  %s1211_s12 = sadd.s32 1, %s1119_s18  }
  0x12   : > { %854 = dma.hbm_to_vmem [thread:$0]  (!%p852_p10), %s153_s25, 256, %s155_s28, [#allocation6], %s1122_s6, %s1122_s6, %s1123_s7  }
  0x13   : > { %857 = dma.hbm_to_vmem [thread:$0]  (!%p852_p10), %s170_s5, 512, %s172_s9, [#allocation6], %s1125_s10, %s1125_s10, %s1126_s11  }
  0x14   : > { %s25_s13 = ssub.s32 %s1119_s18, %s1211_s12  ;;  %s28_s14 = sadd.s32 1, %s1115_s17 }
  0x15   : > { %p26_p12 = scmp.eq.s32.totalorder %s25_s13, 0  ;;  %p35_p13 = scmp.ne.s32.totalorder %s1115_s17, %s1111_s16 }
  0x16   : > { %p36_p0 = scmp.eq.s32.totalorder %s1119_s18, 0  ;;  %p868_p7 = scmp.lt.s32.totalorder %s1119_s18, 2 }
  0x17   : > { %s1220_s20 = scalar_select %p26_p12, %s1115_s17, %s28_s14  }
  0x18   : > { %p37_p3 = por %p36_p0, %p35_p13  ;;  %p1224_p5 = por %p128_p2, %p35_p13 }
  0x19   : > { %s185_s24 = sand.u32 1, %s1115_s17   ;;  %s826_s27 = sshll.u32 %s1119_s18, 5 }
  0x1a   : > { %s778_s25 = sshll.u32 %s185_s24, 5  ;;  %s194_s30 = scalar_lea.hbm %s1386_s0, %s826_s27 }
  0x1b   : > { %s189_s5 = scalar_lea.vmem [#allocation2], %s778_s25  ;;  %s195_s9 = sshll.u32 %s194_s30, 4  ;;  %s196_s9 = int_to_ptr.hbm [resolvable:$true] %s195_s9 }
  0x1c   : > { %s197_s8 = sshll.u32 %s189_s5, 4  ;;  %p1234_p9 = pnand %p868_p7, %p37_p3  ;;  %s198_s8 = int_to_ptr.vmem [resolvable:$true] %s197_s8 }
  0x1d   : > { %s186_s11 = scalar_lea.sflag [#allocation3], %s185_s24  ;;  %s1019_s13 = sshra.s32 %s196_s9, 4  ;;  %s1020_s13 = int_to_ptr.hbm [resolvable:$true] %s1019_s13 }
  0x1e   : > { %s1021_s14 = scalar_lea.hbm %s1020_s13, 32  ;;  %p1023_p10 = pneg %p1234_p9 }
  0x1f   : > { %p1022_p2 = scmp.ne.s32.totalorder %s1020_s13, %s1021_s14  ;;  %s1026_s28 = scalar_lea.hbm %s1386_s0, 64 }
  0x20   : > { %p1027_p0 = scmp.lt.s32.totalorder %s1020_s13, %s1386_s0  ;;  %p1028_p3 = scmp.lt.s32.totalorder %s1026_s28, %s1021_s14 }
  0x21   : > { %p1024_p12 = pnand %p1023_p10, %p1022_p2 }
  0x22   : > { %p1029_p7 = por %p1028_p3, %p1027_p0 }
  0x23   : > { %p1025_p13 = pneg %p1024_p12 }
  0x25   : > { %p1030_p11 = pnand %p1029_p7, %p1025_p13 }
  0x27   : > { %1033 = shalt.err (!%p1030_p11)
}
  0x28   : > { %861 = dma.hbm_to_vmem [thread:$0]  (!%p1234_p9), %s196_s9, 512, %s198_s8, %s186_s11, %s1122_s6, %s1122_s6, %s1123_s7  }
  0x29   : > { %209 = sbr.rel (%p1195_p8) target bundleno = 421 (0x1a5), region = 36  ;;  %s1254_s24 = sand.u32 (!%p1195_p8), 1, %s1111_s16  }
  0x2a   : > { %s782_s5 = sshll.u32 (!%p1195_p8), %s1254_s24, 5  ;;  %s212_s13 = scalar_lea.sflag (!%p1195_p8), [#allocation3], %s1254_s24 }
  0x2b   : > { %s1258_s14 = scalar_lea.vmem (!%p1195_p8), [#allocation2], %s782_s5 }
  0x2e   : > { %1094 = dma.done.wait (%p1182_p4), %s212_s13, 512  }
  0x2f   : > { %1096 = vsyncadd (%p1182_p4), %s212_s13, 4294966784 }
  0x30   : > { %1098 = dma.done.wait (%p42_p1), [#allocation6], 768  }
  0x31   : > { %1100 = vsyncadd (%p42_p1), [#allocation6], 4294966528  ;;  %v832_v0 = vld [vmem:[#allocation5 + $0x8] sm:$0xff]  ;;  %v831_v1 = vld [vmem:[#allocation5] sm:$0xff]  ;;  %vm301_vm0 = vcmask 261120   ;;  %vm652_vm1 = vcmask 1041409  }
  0x32   : > { %320 = vmatpush.bf16.msra.mxu0 %v832_v0  ;;  %833 = vmatpush.bf16.msra.mxu2 %v832_v0  ;;  %v827_v2 = vld [vmem:[%s1258_s14] sm:$0xff]  ;;  %v829_v3 = vld [vmem:[%s1258_s14 + $0x10] sm:$0xff]  ;;  %v828_v4 = vld [vmem:[%s1258_s14 + $0x8] sm:$0xff]  ;;  %vm654_vm2 = vcmask 1042434   ;;  %vm656_vm3 = vcmask 1043459   ;;  %s785_s6 = sshll.u32 %s1254_s24, 3 }
  0x33   : > { %v830_v5 = vld [vmem:[%s1258_s14 + $0x18] sm:$0xff]  ;;  %v354_v6 = vld [vmem:[#allocation7 + $0x18] sm:$0xff]  ;;  %v353_v7 = vld [vmem:[#allocation7 + $0x10] sm:$0xff]  ;;  %vm658_vm4 = vcmask 1044484   ;;  %s823_s7 = sshll.u32 %s1173_s19, 3  ;;  %vm660_vm5 = vcmask 1045509  }
  0x34   : > { %391 = vmatpush.msra.mxu1 %v354_v6  ;;  %835 = vmatpush.msra.mxu3 %v354_v6  ;;  %v352_v8 = vld [vmem:[#allocation7 + $0x8] sm:$0xff]  ;;  %v351_v9 = vld [vmem:[#allocation7] sm:$0xff]  ;;  %v910_v10 = vld [vmem:[%s1388_s2] ss:$0 sm:$0xff]  ;;  %s679_s10 = scalar_lea.hbm %s1390_s4, %s823_s7  ;;  %vm662_vm6 = vcmask 1046534   ;;  %s250_s11 = scalar_lea.vmem [#allocation8], %s785_s6 }
  0x35   : > { %s681_s27 = sshll.u32 %s250_s11, 4  ;;  %s683_s19 = sshll.u32 %s679_s10, 4  ;;  %vm664_vm7 = vcmask 1047559   ;;  %s682_s27 = int_to_ptr.vmem [resolvable:$true] %s681_s27  ;;  %s684_s19 = int_to_ptr.hbm [resolvable:$true] %s683_s19 }
  0x36   : > { %321 = vmatpush.bf16.msra.mxu0 %v831_v1  ;;  %834 = vmatpush.bf16.msra.mxu2 %v831_v1  ;;  %s669_s25 = scalar_lea.sflag [#allocation4], %s1254_s24  ;;  %s1063_s28 = sshra.s32 %s684_s19, 4  ;;  %s1064_s28 = int_to_ptr.hbm [resolvable:$true] %s1063_s28 }
  0x37   : > { %392 = vmatpush.msra.mxu1 %v353_v7  ;;  %836 = vmatpush.msra.mxu3 %v353_v7  ;;  %s1065_s29 = scalar_lea.hbm %s1064_s28, 8  ;;  %s1069_s13 = scalar_lea.hbm %s1390_s4, 16 }
  0x38   : > { %p1066_p1 = scmp.ne.s32.totalorder %s1064_s28, %s1065_s29  ;;  %p1070_p11 = scmp.lt.s32.totalorder %s1064_s28, %s1390_s4 }
  0x39   : > { %810 = vmatmul.msk.bf16.vlgmr.msra.gmra.mxu0 %vm301_vm0, %v827_v2  ;;  %812 = vmatmul.msk.bf16.vlgmr.msra.gmra.mxu2 %vm301_vm0, %v829_v3  ;;  %p1071_p9 = scmp.lt.s32.totalorder %s1069_s13, %s1065_s29 }
  0x3a   : > { %393 = vmatpush.msra.mxu1 %v352_v8  ;;  %837 = vmatpush.msra.mxu3 %v352_v8  ;;  %p1067_p4 = pnand %p1066_p1, %p1224_p5 }
  0x3b   : > { %p1072_p2 = por %p1071_p9, %p1070_p11 }
  0x3c   : > { %394 = vmatpush.msra.mxu1 %v351_v9  ;;  %838 = vmatpush.msra.mxu3 %v351_v9  ;;  %p1068_p8 = pneg %p1067_p4 }
  0x3e   : > { %p1073_p10 = pnand %p1072_p2, %p1068_p8 }
  0x49   : > { %811 = vmatmul.msk.bf16.gmra.mxu0 %vm301_vm0, %v828_v4  ;;  %813 = vmatmul.msk.bf16.gmra.mxu2 %vm301_vm0, %v830_v5 }
  0xb6   : > { %v323_v11 = vpop.f32.mrf.mxu0 }
  0xb7   : > { %v324_v12 = vadd.f32 %v910_v10, %v323_v11 }
  0xb9   : > { %911 = vtanh.f32 %v324_v12 }
  0xbc   : > { %v333_v13 = vpop.f32.mrf.mxu2 }
  0xbd   : > { %v334_v14 = vadd.f32 %v910_v10, %v333_v13 }
  0xbe   : > { %v325_v15 = vpop.f32.mrf.mxu0 }
  0xbf   : > { %v912_v16 = vpop.eup %911  ;;  %913 = vtanh.f32 %v334_v14  ;;  %v326_v17 = vadd.f32 %v910_v10, %v325_v15 }
  0xc0   : > { %814 = vmatmul.msk.f32.vlgmr.msra.gmra.mxu1 %vm301_vm0, %v912_v16 }
  0xc1   : > { %915 = vtanh.f32 %v326_v17 }
  0xc4   : > { %v335_v18 = vpop.f32.mrf.mxu2 }
  0xc5   : > { %v914_v19 = vpop.eup %913  ;;  %v336_v20 = vadd.f32 %v910_v10, %v335_v18 }
  0xc6   : > { %v328_v21 = vpop.f32.mrf.mxu0  ;;  %818 = vmatmul.msk.f32.vlgmr.msra.gmra.mxu3 %vm301_vm0, %v914_v19 }
  0xc7   : > { %v916_v22 = vpop.eup %915  ;;  %917 = vtanh.f32 %v336_v20  ;;  %v329_v23 = vadd.f32 %v910_v10, %v328_v21 }
  0xc8   : > { %815 = vmatmul.msk.f32.gmra.mxu1 %vm301_vm0, %v916_v22 }
  0xc9   : > { %919 = vtanh.f32 %v329_v23 }
  0xcc   : > { %v338_v24 = vpop.f32.mrf.mxu2 }
  0xcd   : > { %v918_v25 = vpop.eup %917  ;;  %v339_v26 = vadd.f32 %v910_v10, %v338_v24 }
  0xce   : > { %v330_v27 = vpop.f32.mrf.mxu0  ;;  %819 = vmatmul.msk.f32.gmra.mxu3 %vm301_vm0, %v918_v25 }
  0xcf   : > { %v920_v28 = vpop.eup %919  ;;  %921 = vtanh.f32 %v339_v26  ;;  %v331_v29 = vadd.f32 %v910_v10, %v330_v27 }
  0xd0   : > { %816 = vmatmul.msk.f32.gmra.mxu1 %vm301_vm0, %v920_v28 }
  0xd1   : > { %923 = vtanh.f32 %v331_v29 }
  0xd4   : > { %v340_v30 = vpop.f32.mrf.mxu2 }
  0xd5   : > { %v922_v31 = vpop.eup %921  ;;  %v341_v32 = vadd.f32 %v910_v10, %v340_v30 }
  0xd6   : > { %820 = vmatmul.msk.f32.gmra.mxu3 %vm301_vm0, %v922_v31 }
  0xd7   : > { %v924_v33 = vpop.eup %923  ;;  %925 = vtanh.f32 %v341_v32 }
  0xd8   : > { %817 = vmatmul.msk.f32.gmra.mxu1 %vm301_vm0, %v924_v33 }
  0xdd   : > { %v926_v34 = vpop.eup %925 }
  0xde   : > { %821 = vmatmul.msk.f32.gmra.mxu3 %vm301_vm0, %v926_v34 }
 0x13d   : > { %v396_v35 = vpop.f32.mrf.mxu1 }
 0x13e   : > { %v420_v36 = vsel %vm301_vm0, %v396_v35, -inf }
 0x13f   : > { %v421_v37 = vrot.slane %v420_v36, 4 }
 0x141   : > { %v422_v38 = vmax.f32 %v420_v36, %v421_v37 }
 0x143   : > { %v423_v39 = vrot.slane %v422_v38, 2 }
 0x145   : > { %v424_v40 = vmax.f32 %v422_v38, %v423_v39  ;;  %v399_v41 = vpop.f32.mrf.mxu1 }
 0x146   : > { %v427_v42 = vsel %vm301_vm0, %v399_v41, -inf }
 0x147   : > { %v425_v43 = vrot.slane %v424_v40, 1  ;;  %v428_v44 = vrot.slane %v427_v42, 4 }
 0x149   : > { %v426_v45 = vmax.f32 %v424_v40, %v425_v43  ;;  %v429_v46 = vmax.f32 %v427_v42, %v428_v44  ;;  %v408_v47 = vpop.f32.mrf.mxu3 }
 0x14a   : > { %v448_v48 = vsel %vm301_vm0, %v408_v47, -inf }
 0x14b   : > { %v476_v49 = vsub.f32 %v396_v35, %v426_v45  ;;  %v430_v50 = vrot.slane %v429_v46, 2  ;;  %v449_v51 = vrot.slane %v448_v48, 4 }
 0x14d   : > { %v484_v52 = vmul.f32 1.442695, %v476_v49  ;;  %v431_v53 = vmax.f32 %v429_v46, %v430_v50  ;;  %v450_v54 = vmax.f32 %v448_v48, %v449_v51  ;;  %v402_v55 = vpop.f32.mrf.mxu1 }
 0x14e   : > { %v434_v56 = vsel %vm301_vm0, %v402_v55, -inf }
 0x14f   : > { %927 = vpow2.f32 %v484_v52  ;;  %v432_v57 = vrot.slane %v431_v53, 1  ;;  %v451_v58 = vrot.slane %v450_v54, 2  ;;  %v435_v59 = vrot.slane %v434_v56, 4 }
 0x151   : > { %v433_v60 = vmax.f32 %v431_v53, %v432_v57  ;;  %v452_v61 = vmax.f32 %v450_v54, %v451_v58  ;;  %v436_v62 = vmax.f32 %v434_v56, %v435_v59  ;;  %v411_v63 = vpop.f32.mrf.mxu3 }
 0x152   : > { %v455_v0 = vsel %vm301_vm0, %v411_v63, -inf }
 0x153   : > { %v477_v1 = vsub.f32 %v399_v41, %v433_v60  ;;  %v453_v2 = vrot.slane %v452_v61, 1  ;;  %v437_v3 = vrot.slane %v436_v62, 2  ;;  %v456_v4 = vrot.slane %v455_v0, 4 }
 0x155   : > { %v1292_v5 = vpop.eup %927  ;;  %v486_v6 = vmul.f32 1.442695, %v477_v1  ;;  %v454_v7 = vmax.f32 %v452_v61, %v453_v2  ;;  %v438_v8 = vmax.f32 %v436_v62, %v437_v3  ;;  %v457_v9 = vmax.f32 %v455_v0, %v456_v4  ;;  %v405_v10 = vpop.f32.mrf.mxu1 }
 0x156   : > { %v500_v11 = vsel %vm301_vm0, %v1292_v5, 0.0  ;;  %v441_v12 = vsel %vm301_vm0, %v405_v10, -inf }
 0x157   : > { %v501_v13 = vrot.slane %v500_v11, 4  ;;  %929 = vpow2.f32 %v486_v6  ;;  %v480_v14 = vsub.f32 %v408_v47, %v454_v7  ;;  %v439_v15 = vrot.slane %v438_v8, 1 }
 0x158   : > { %v458_v16 = vrot.slane %v457_v9, 2  ;;  %v442_v17 = vrot.slane %v441_v12, 4 }
 0x159   : > { %v502_v18 = vadd.f32 %v501_v13, %v500_v11  ;;  %v492_v19 = vmul.f32 1.442695, %v480_v14  ;;  %v440_v20 = vmax.f32 %v438_v8, %v439_v15  ;;  %v414_v21 = vpop.f32.mrf.mxu3 }
 0x15a   : > { %v459_v22 = vmax.f32 %v457_v9, %v458_v16  ;;  %v443_v23 = vmax.f32 %v441_v12, %v442_v17  ;;  %v462_v24 = vsel %vm301_vm0, %v414_v21, -inf }
 0x15b   : > { %931 = vpow2.f32 %v492_v19  ;;  %v478_v25 = vsub.f32 %v402_v55, %v440_v20  ;;  %v463_v26 = vrot.slane %v462_v24, 4  ;;  %v503_v30 = vrot.slane %v502_v18, 2 }
 0x15c   : > { %v460_v27 = vrot.slane %v459_v22, 1  ;;  %v444_v28 = vrot.slane %v443_v23, 2 }
 0x15d   : > { %v1298_v29 = vpop.eup %929  ;;  %v488_v31 = vmul.f32 1.442695, %v478_v25  ;;  %v464_v32 = vmax.f32 %v462_v24, %v463_v26  ;;  %v504_v41 = vadd.f32 %v503_v30, %v502_v18 }
 0x15e   : > { %v507_v33 = vsel %vm301_vm0, %v1298_v29, 0.0  ;;  %v461_v34 = vmax.f32 %v459_v22, %v460_v27  ;;  %v445_v35 = vmax.f32 %v443_v23, %v444_v28 }
 0x15f   : > { %v508_v36 = vrot.slane %v507_v33, 4  ;;  %933 = vpow2.f32 %v488_v31  ;;  %v465_v39 = vrot.slane %v464_v32, 2  ;;  %v505_v57 = vrot.slane %v504_v41, 1 }
 0x160   : > { %v481_v37 = vsub.f32 %v411_v63, %v461_v34  ;;  %v446_v38 = vrot.slane %v445_v35, 1  ;;  %v253_v34 = vld [vmem:[%s1258_s14] sm:$0xff]  }
 0x161   : > { %v1302_v40 = vpop.eup %931  ;;  %v509_v42 = vadd.f32 %v508_v36, %v507_v33  ;;  %v1304_v43 = vpop.f32.mrf.mxu3  ;;  %v466_v47 = vmax.f32 %v464_v32, %v465_v39  ;;  %v506_v7 = vadd.f32 %v505_v57, %v504_v41  ;;  %v573_v39 = vunpack.c.h.bf16 %v253_v34  ;;  %v255_v41 = vld [vmem:[%s1258_s14 + $0x8] sm:$0xff]  }
 0x162   : > { %v528_v44 = vsel %vm301_vm0, %v1302_v40, 0.0  ;;  %v494_v45 = vmul.f32 1.442695, %v481_v37  ;;  %v447_v46 = vmax.f32 %v445_v35, %v446_v38  ;;  %v469_v52 = vsel %vm301_vm0, %v1304_v43, -inf }
 0x163   : > { %v510_v48 = vrot.slane %v509_v42, 2  ;;  %v529_v49 = vrot.slane %v528_v44, 4  ;;  %v467_v51 = vrot.slane %v466_v47, 1  ;;  %v470_v56 = vrot.slane %v469_v52, 4 }
 0x164   : > { %935 = vpow2.f32 %v494_v45  ;;  %v479_v50 = vsub.f32 %v405_v10, %v447_v46 }
 0x165   : > { %v1310_v53 = vpop.eup %933  ;;  %v511_v54 = vadd.f32 %v510_v48, %v509_v42  ;;  %v530_v55 = vadd.f32 %v529_v49, %v528_v44  ;;  %v468_v60 = vmax.f32 %v466_v47, %v467_v51  ;;  %v471_v0 = vmax.f32 %v469_v52, %v470_v56 }
 0x166   : > { %v514_v58 = vsel %vm301_vm0, %v1310_v53, 0.0  ;;  %v490_v59 = vmul.f32 1.442695, %v479_v50  ;;  %v574_v49 = vunpack.c.l.bf16 %v255_v41 }
 0x167   : > { %v512_v61 = vrot.slane %v511_v54, 1  ;;  %v531_v62 = vrot.slane %v530_v55, 2  ;;  %v515_v63 = vrot.slane %v514_v58, 4  ;;  %v482_v1 = vsub.f32 %v414_v21, %v468_v60 }
 0x168   : > { %937 = vpow2.f32 %v490_v59  ;;  %v472_v9 = vrot.slane %v471_v0, 2 }
 0x169   : > { %v513_v2 = vadd.f32 %v512_v61, %v511_v54  ;;  %v532_v3 = vadd.f32 %v531_v62, %v530_v55  ;;  %v516_v4 = vadd.f32 %v515_v63, %v514_v58  ;;  %v496_v8 = vmul.f32 1.442695, %v482_v1  ;;  %v257_v54 = vld [vmem:[%s1258_s14 + $0x10] sm:$0xff]  }
 0x16a   : > { %v1314_v6 = vpop.eup %935  ;;  %v473_v14 = vmax.f32 %v471_v0, %v472_v9  ;;  %v576_v60 = vunpack.c.l.bf16 %v257_v54 }
 0x16b   : > { %939 = vrcp.f32 %v513_v2  ;;  %v533_v10 = vrot.slane %v532_v3, 1  ;;  %v517_v11 = vrot.slane %v516_v4, 2  ;;  %v535_v12 = vsel %vm301_vm0, %v1314_v6, 0.0 }
 0x16c   : > { %v536_v13 = vrot.slane %v535_v12, 4  ;;  %941 = vpow2.f32 %v496_v8  ;;  %v474_v19 = vrot.slane %v473_v14, 1 }
 0x16d   : > { %v518_v15 = vadd.f32 %v517_v11, %v516_v4  ;;  %943 = vrcp.f32 %v506_v7  ;;  %v534_v17 = vadd.f32 %v533_v10, %v532_v3  ;;  %v575_v11 = vunpack.c.h.bf16 %v255_v41 }
 0x16e   : > { %v1318_v16 = vpop.eup %937  ;;  %v537_v18 = vadd.f32 %v536_v13, %v535_v12  ;;  %v475_v24 = vmax.f32 %v473_v14, %v474_v19 }
 0x16f   : > { %v519_v20 = vrot.slane %v518_v15, 1  ;;  %v521_v21 = vsel %vm301_vm0, %v1318_v16, 0.0  ;;  %945 = vrcp.f32 %v534_v17 }
 0x170   : > { %v538_v22 = vrot.slane %v537_v18, 2  ;;  %v522_v23 = vrot.slane %v521_v21, 4  ;;  %v483_v31 = vsub.f32 %v1304_v43, %v475_v24  ;;  %v572_v43 = vunpack.c.l.bf16 %v253_v34 }
 0x171   : > { %v940_v25 = vpop.eup %939  ;;  %v520_v26 = vadd.f32 %v519_v20, %v518_v15  ;;  %v259_v20 = vld [vmem:[%s1258_s14 + $0x18] sm:$0xff]  }
 0x172   : > { %v1322_v27 = vpop.eup %941  ;;  %v539_v28 = vadd.f32 %v538_v22, %v537_v18  ;;  %v523_v30 = vadd.f32 %v522_v23, %v521_v21  ;;  %v565_v38 = vmul.f32 %v940_v25, %v1298_v29  ;;  %v498_v42 = vmul.f32 1.442695, %v483_v31 }
 0x173   : > { %947 = vrcp.f32 %v520_v26  ;;  %v542_v32 = vsel %vm301_vm0, %v1322_v27, 0.0  ;;  %v944_v33 = vpop.eup %943 }
 0x174   : > { %v540_v35 = vrot.slane %v539_v28, 1  ;;  %v524_v36 = vrot.slane %v523_v30, 2  ;;  %v543_v37 = vrot.slane %v542_v32, 4  ;;  %v564_v46 = vmul.f32 %v944_v33, %v1292_v5 }
 0x175   : > { %949 = vpow2.f32 %v498_v42  ;;  %v946_v48 = vpop.eup %945  ;;  %v581_v52 = vmul.f32 %v573_v39, %v565_v38 }
 0x176   : > { %v541_v44 = vadd.f32 %v540_v35, %v539_v28  ;;  %v525_v45 = vadd.f32 %v524_v36, %v523_v30  ;;  %v544_v47 = vadd.f32 %v543_v37, %v542_v32  ;;  %v580_v57 = vmul.f32 %v572_v43, %v564_v46 }
 0x177   : > { %v568_v59 = vmul.f32 %v946_v48, %v1302_v40  ;;  %v595_v62 = vsel %vm301_vm0, %v581_v52, 0.0  ;;  %v577_v40 = vunpack.c.h.bf16 %v257_v54  ;;  %v578_v30 = vunpack.c.l.bf16 %v259_v20 }
 0x178   : > { %951 = vrcp.f32 %v541_v44  ;;  %v526_v50 = vrot.slane %v525_v45, 1  ;;  %v545_v55 = vrot.slane %v544_v47, 2  ;;  %v596_v4 = vrot.slane %v595_v62, 4 }
 0x179   : > { %v948_v51 = vpop.eup %947  ;;  %v584_v7 = vmul.f32 %v576_v60, %v568_v59 }
 0x17a   : > { %v566_v29 = vmul.f32 %v948_v51, %v1310_v53  ;;  %v527_v56 = vadd.f32 %v526_v50, %v525_v45  ;;  %v546_v58 = vadd.f32 %v545_v55, %v544_v47  ;;  %v588_v53 = vsel %vm301_vm0, %v580_v57, 0.0 }
 0x17b   : > { %v1334_v61 = vpop.eup %949  ;;  %v589_v13 = vrot.slane %v588_v53, 4  ;;  %v597_v18 = vadd.f32 %v596_v4, %v595_v62  ;;  %v616_v19 = vsel %vm301_vm0, %v584_v7, 0.0  ;;  %v579_v55 = vunpack.c.h.bf16 %v259_v20 }
 0x17c   : > { %v582_v5 = vmul.f32 %v574_v49, %v566_v29  ;;  %953 = vrcp.f32 %v527_v56  ;;  %v547_v63 = vrot.slane %v546_v58, 1  ;;  %v549_v2 = vsel %vm301_vm0, %v1334_v61, 0.0 }
 0x17d   : > { %v550_v9 = vrot.slane %v549_v2, 4  ;;  %v590_v23 = vadd.f32 %v589_v13, %v588_v53  ;;  %v617_v25 = vrot.slane %v616_v19, 4  ;;  %v598_v32 = vrot.slane %v597_v18, 2 }
 0x17e   : > { %v952_v0 = vpop.eup %951  ;;  %v602_v1 = vsel %vm301_vm0, %v582_v5, 0.0  ;;  %v548_v8 = vadd.f32 %v547_v63, %v546_v58 }
 0x17f   : > { %v569_v3 = vmul.f32 %v952_v0, %v1314_v6  ;;  %v603_v10 = vrot.slane %v602_v1, 4  ;;  %v551_v14 = vadd.f32 %v550_v9, %v549_v2  ;;  %v591_v36 = vrot.slane %v590_v23, 2 }
 0x180   : > { %955 = vrcp.f32 %v548_v8  ;;  %v618_v41 = vadd.f32 %v617_v25, %v616_v19  ;;  %v599_v44 = vadd.f32 %v598_v32, %v597_v18 }
 0x181   : > { %v585_v15 = vmul.f32 %v577_v40, %v569_v3  ;;  %v552_v6 = vrot.slane %v551_v14, 2  ;;  %v604_v21 = vadd.f32 %v603_v10, %v602_v1  ;;  %v592_v47 = vadd.f32 %v591_v36, %v590_v23 }
 0x182   : > { %v954_v12 = vpop.eup %953  ;;  %v619_v51 = vrot.slane %v618_v41, 2  ;;  %v600_v52 = vrot.slane %v599_v44, 1 }
 0x183   : > { %v567_v17 = vmul.f32 %v954_v12, %v1318_v16  ;;  %v553_v24 = vadd.f32 %v552_v6, %v551_v14  ;;  %v623_v26 = vsel %vm301_vm0, %v585_v15, 0.0  ;;  %v605_v16 = vrot.slane %v604_v21, 2 }
 0x184   : > { %v624_v37 = vrot.slane %v623_v26, 4  ;;  %v593_v56 = vrot.slane %v592_v47, 1  ;;  %v620_v59 = vadd.f32 %v619_v51, %v618_v41  ;;  %v601_v62 = vadd.f32 %v600_v52, %v599_v44 }
 0x185   : > { %v583_v22 = vmul.f32 %v575_v11, %v567_v17  ;;  %v554_v34 = vrot.slane %v553_v24, 1  ;;  %v606_v46 = vadd.f32 %v605_v16, %v604_v21 }
 0x186   : > { %v956_v31 = vpop.eup %955  ;;  %v625_v48 = vadd.f32 %v624_v37, %v623_v26  ;;  %v594_v1 = vadd.f32 %v593_v56, %v592_v47  ;;  %v621_v3 = vrot.slane %v620_v59, 1 }
 0x187   : > { %v609_v28 = vsel %vm301_vm0, %v583_v22, 0.0  ;;  %v570_v35 = vmul.f32 %v956_v31, %v1322_v27  ;;  %v555_v39 = vadd.f32 %v554_v34, %v553_v24  ;;  %v607_v27 = vrot.slane %v606_v46, 1 }
 0x188   : > { %v610_v33 = vrot.slane %v609_v28, 4  ;;  %v626_v57 = vrot.slane %v625_v48, 2  ;;  %v653_v8 = vsel %vm652_vm1, %v601_v62, %v594_v1  ;;  %v622_v12 = vadd.f32 %v621_v3, %v620_v59 }
 0x189   : > { %v586_v42 = vmul.f32 %v578_v30, %v570_v35  ;;  %957 = vrcp.f32 %v555_v39  ;;  %v608_v63 = vadd.f32 %v607_v27, %v606_v46 }
 0x18a   : > { %v611_v38 = vadd.f32 %v610_v33, %v609_v28  ;;  %v627_v2 = vadd.f32 %v626_v57, %v625_v48 }
 0x18b   : > { %v630_v43 = vsel %vm301_vm0, %v586_v42, 0.0  ;;  %v655_v9 = vsel %vm654_vm2, %v608_v63, %v653_v8 }
 0x18c   : > { %v612_v45 = vrot.slane %v611_v38, 2  ;;  %v631_v50 = vrot.slane %v630_v43, 4  ;;  %v628_v10 = vrot.slane %v627_v2, 1 }
 0x18e   : > { %v613_v49 = vadd.f32 %v612_v45, %v611_v38  ;;  %v632_v54 = vadd.f32 %v631_v50, %v630_v43  ;;  %v629_v18 = vadd.f32 %v628_v10, %v627_v2 }
 0x18f   : > { %v958_v29 = vpop.eup %957 }
 0x190   : > { %v614_v58 = vrot.slane %v613_v49, 1  ;;  %v633_v60 = vrot.slane %v632_v54, 2  ;;  %v571_v5 = vmul.f32 %v958_v29, %v1334_v61 }
 0x192   : > { %v587_v0 = vmul.f32 %v579_v55, %v571_v5  ;;  %v615_v53 = vadd.f32 %v614_v58, %v613_v49  ;;  %v634_v40 = vadd.f32 %v633_v60, %v632_v54 }
 0x194   : > { %v637_v4 = vsel %vm301_vm0, %v587_v0, 0.0  ;;  %v657_v11 = vsel %vm656_vm3, %v615_v53, %v655_v9  ;;  %v635_v13 = vrot.slane %v634_v40, 1 }
 0x195   : > { %v638_v7 = vrot.slane %v637_v4, 4  ;;  %v659_v15 = vsel %vm658_vm4, %v622_v12, %v657_v11 }
 0x196   : > { %v636_v19 = vadd.f32 %v635_v13, %v634_v40  ;;  %v661_v6 = vsel %vm660_vm5, %v629_v18, %v659_v15 }
 0x197   : > { %v639_v61 = vadd.f32 %v638_v7, %v637_v4 }
 0x198   : > { %v663_v22 = vsel %vm662_vm6, %v636_v19, %v661_v6 }
 0x199   : > { %v640_v14 = vrot.slane %v639_v61, 2 }
 0x19b   : > { %v641_v17 = vadd.f32 %v640_v14, %v639_v61 }
 0x19d   : > { %v642_v20 = vrot.slane %v641_v17, 1 }
 0x19f   : > { %v643_v21 = vadd.f32 %v642_v20, %v641_v17 }
 0x1a1   : > { %v665_v23 = vsel %vm664_vm7, %v643_v21, %v663_v22 }
 0x1a2   : > { %667 = vst.msk [vmem:[%s250_s11] sm:$0xff] %vm301_vm0, %v665_v23 }
 0x1a3   : > { %1076 = shalt.err (!%p1073_p10)
}
 0x1a4   : > { %849 = dma.vmem_to_hbm [thread:$0]  (%p1224_p5), %s682_s27, 128, %s684_s19, %s669_s25  }
 0x1a5 PF: > { %s695_s24 = sand.u32 1, %s1107_s15   ;;  %p1396_p12 = scmp.ge.s32.totalorder %s1119_s18, 2 }
 0x1a6   : > { %s696_s26 = scalar_lea.sflag [#allocation4], %s695_s24 }
 0x1a7   : > { %p863_p13 = pnand %p1396_p12, %p1187_p6 }
 0x1a9   : > { %p864_p0 = pneg %p863_p13 }
 0x1ab   : > { %1102 = dma.done.wait (%p864_p0), %s696_s26, 128  }
 0x1ac   : > { %1104 = vsyncadd (%p864_p0), %s696_s26, 4294967168  ;;  %p18_p3 = scmp.ge.s32.totalorder %s1211_s12, 4   ;;  %s1397_s15 = smov %s1111_s16 }
 0x1ad   : > { %s1398_s16 = smov %s1115_s17  ;;  %s1399_s17 = smov %s1220_s20 }
 0x1ae   : > { %s1400_s18 = smov %s1211_s12  ;;  %20 = sbr.rel (!%p18_p3) target bundleno = 6 (0x6), region = 89 }
 0x1b3   :  { %702 = vsyncpa [#allocation3], 1 }
 0x1b4   :  { %704 = vsyncpa [#allocation3 + $0x1], 1 }
 0x1b5   :  { %705 = vsyncpa [#allocation6], 1 }
 0x1b6   :  { %706 = vsyncpa [#allocation4], 1 }
 0x1b7   :  { %708 = vsyncpa [#allocation4 + $0x1], 1 }

// kernel: tpu_custom_call.1
= control target key start
LH: loop header
LB: loop body
LE: loop exit
PB: predicated region body
PF: predicated region fallthrough
CT: control target
= control target key end

     0   :  { %9 = vsyncpa [#allocation3], 0  ;;  %s1386_s0 = inlined_call_operand.hbm [shape: bf16[16,8,32], index: 0, kind: input, shape index: {}]   ;;  %s1387_s1 = inlined_call_operand.hbm [shape: bf16[32,32], index: 1, kind: input, shape index: {}]   ;;  %s1388_s2 = inlined_call_operand.vmem [shape: f32[1,32], index: 2, kind: input, shape index: {}]   ;;  %s1389_s3 = inlined_call_operand.hbm [shape: f32[32,32], index: 3, kind: input, shape index: {}]   ;;  %s1390_s4 = inlined_call_operand.hbm [shape: f32[16,32], index: 4, kind: output, shape index: {}]  }
   0x1   :  { %11 = vsyncpa [#allocation3 + $0x1], 0 }
   0x2   :  { %12 = vsyncpa [#allocation6], 0 }
   0x3   :  { %13 = vsyncpa [#allocation4], 0 }
   0x4   :  { %15 = vsyncpa [#allocation4 + $0x1], 0  ;;  %s1152_s15 = smov 0   ;;  %s1154_s16 = smov 0  }
   0x5   :  { %s1156_s17 = smov 0   ;;  %s1158_s18 = smov 0  }
   0x6 LB: > { %s1173_s19 = sadd.s32 4294967295, %s1119_s18   ;;  %s773_s20 = sadd.s32 4294967294, %s1119_s18   ;;  %s1119_s18 = sphi %s1158_s18, %s1400_s18   ;;  %s1115_s17 = sphi %s1156_s17, %s1399_s17   ;;  %s1111_s16 = sphi %s1154_s16, %s1398_s16   ;;  %s1107_s15 = sphi %s1152_s15, %s1397_s15  }
   0x7   : > { %p41_p0 = scmp.ne.s32.totalorder %s1111_s16, %s1107_s15  ;;  %p42_p1 = scmp.eq.s32.totalorder %s1173_s19, 0 }
   0x8   : > { %p128_p2 = scmp.eq.s32.totalorder %s1173_s19, 1  ;;  %p134_p3 = scmp.eq.s32.totalorder %s773_s20, 1 }
   0x9   : > { %p1182_p4 = por %p42_p1, %p41_p0  ;;  %p774_p5 = scmp.ge.s32.totalorder %s1119_s18, 1 }
   0xa   : > { %p1187_p6 = por %p134_p3, %p41_p0  ;;  %p141_p7 = scmp.lt.s32.totalorder %s1119_s18, 3 }
   0xb   : > { %s152_s25 = sshll.u32 %s1387_s1, 4  ;;  %s1121_s27 = smov [#allocation5]   ;;  %s153_s25 = int_to_ptr.hbm [resolvable:$true] %s152_s25 }
   0xc   : > { %p1195_p8 = pnand %p774_p5, %p141_p7  ;;  %s154_s28 = sshll.u32 %s1121_s27, 4  ;;  %s155_s28 = int_to_ptr.vmem [resolvable:$true] %s154_s28 }
   0xd   : > { %s169_s5 = sshll.u32 %s1389_s3, 4  ;;  %s1122_s6 = smov 64   ;;  %s170_s5 = int_to_ptr.hbm [resolvable:$true] %s169_s5 }
   0xe   : > { %p851_p9 = pneg %p1195_p8  ;;  %s1123_s7 = smov 4  }
   0xf   : > { %s1124_s8 = smov [#allocation7]   ;;  %s1125_s10 = smov 128  }
  0x10   : > { %p852_p10 = pnand %p851_p9, %p42_p1  ;;  %s171_s9 = sshll.u32 %s1124_s8, 4  ;;  %s172_s9 = int_to_ptr.vmem [resolvable:$true] %s171_s9 }
  0x11   : > { %s1126_s11 = smov 8   ;;  %s1211_s12 = sadd.s32 1, %s1119_s18  }
  0x12   : > { %854 = dma.hbm_to_vmem [thread:$0]  (!%p852_p10), %s153_s25, 256, %s155_s28, [#allocation6], %s1122_s6, %s1122_s6, %s1123_s7  }
  0x13   : > { %857 = dma.hbm_to_vmem [thread:$0]  (!%p852_p10), %s170_s5, 512, %s172_s9, [#allocation6], %s1125_s10, %s1125_s10, %s1126_s11  }
  0x14   : > { %s25_s13 = ssub.s32 %s1119_s18, %s1211_s12  ;;  %s28_s14 = sadd.s32 1, %s1115_s17 }
  0x15   : > { %p26_p12 = scmp.eq.s32.totalorder %s25_s13, 0  ;;  %p35_p13 = scmp.ne.s32.totalorder %s1115_s17, %s1111_s16 }
  0x16   : > { %p36_p0 = scmp.eq.s32.totalorder %s1119_s18, 0  ;;  %p868_p7 = scmp.lt.s32.totalorder %s1119_s18, 2 }
  0x17   : > { %s1220_s20 = scalar_select %p26_p12, %s1115_s17, %s28_s14  }
  0x18   : > { %p37_p3 = por %p36_p0, %p35_p13  ;;  %p1224_p5 = por %p128_p2, %p35_p13 }
  0x19   : > { %s185_s24 = sand.u32 1, %s1115_s17   ;;  %s826_s27 = sshll.u32 %s1119_s18, 5 }
  0x1a   : > { %s778_s25 = sshll.u32 %s185_s24, 5  ;;  %s194_s30 = scalar_lea.hbm %s1386_s0, %s826_s27 }
  0x1b   : > { %s189_s5 = scalar_lea.vmem [#allocation2], %s778_s25  ;;  %s195_s9 = sshll.u32 %s194_s30, 4  ;;  %s196_s9 = int_to_ptr.hbm [resolvable:$true] %s195_s9 }
  0x1c   : > { %s197_s8 = sshll.u32 %s189_s5, 4  ;;  %p1234_p9 = pnand %p868_p7, %p37_p3  ;;  %s198_s8 = int_to_ptr.vmem [resolvable:$true] %s197_s8 }
  0x1d   : > { %s186_s11 = scalar_lea.sflag [#allocation3], %s185_s24  ;;  %s1019_s13 = sshra.s32 %s196_s9, 4  ;;  %s1020_s13 = int_to_ptr.hbm [resolvable:$true] %s1019_s13 }
  0x1e   : > { %s1021_s14 = scalar_lea.hbm %s1020_s13, 32  ;;  %p1023_p10 = pneg %p1234_p9 }
  0x1f   : > { %p1022_p2 = scmp.ne.s32.totalorder %s1020_s13, %s1021_s14  ;;  %s1026_s28 = scalar_lea.hbm %s1386_s0, 64 }
  0x20   : > { %p1027_p0 = scmp.lt.s32.totalorder %s1020_s13, %s1386_s0  ;;  %p1028_p3 = scmp.lt.s32.totalorder %s1026_s28, %s1021_s14 }
  0x21   : > { %p1024_p12 = pnand %p1023_p10, %p1022_p2 }
  0x22   : > { %p1029_p7 = por %p1028_p3, %p1027_p0 }
  0x23   : > { %p1025_p13 = pneg %p1024_p12 }
  0x25   : > { %p1030_p11 = pnand %p1029_p7, %p1025_p13 }
  0x27   : > { %1033 = shalt.err (!%p1030_p11)
}
  0x28   : > { %861 = dma.hbm_to_vmem [thread:$0]  (!%p1234_p9), %s196_s9, 512, %s198_s8, %s186_s11, %s1122_s6, %s1122_s6, %s1123_s7  }
  0x29   : > { %209 = sbr.rel (%p1195_p8) target bundleno = 421 (0x1a5), region = 36  ;;  %s1254_s24 = sand.u32 (!%p1195_p8), 1, %s1111_s16  }
  0x2a   : > { %s782_s5 = sshll.u32 (!%p1195_p8), %s1254_s24, 5  ;;  %s212_s13 = scalar_lea.sflag (!%p1195_p8), [#allocation3], %s1254_s24 }
  0x2b   : > { %s1258_s14 = scalar_lea.vmem (!%p1195_p8), [#allocation2], %s782_s5 }
  0x2e   : > { %1094 = dma.done.wait (%p1182_p4), %s212_s13, 512  }
  0x2f   : > { %1096 = vsyncadd (%p1182_p4), %s212_s13, 4294966784 }
  0x30   : > { %1098 = dma.done.wait (%p42_p1), [#allocation6], 768  }
  0x31   : > { %1100 = vsyncadd (%p42_p1), [#allocation6], 4294966528  ;;  %v832_v0 = vld [vmem:[#allocation5 + $0x8] sm:$0xff]  ;;  %v831_v1 = vld [vmem:[#allocation5] sm:$0xff]  ;;  %vm301_vm0 = vcmask 261120   ;;  %vm652_vm1 = vcmask 1041409  }
  0x32   : > { %320 = vmatpush.bf16.msra.mxu0 %v832_v0  ;;  %833 = vmatpush.bf16.msra.mxu2 %v832_v0  ;;  %v827_v2 = vld [vmem:[%s1258_s14] sm:$0xff]  ;;  %v829_v3 = vld [vmem:[%s1258_s14 + $0x10] sm:$0xff]  ;;  %v828_v4 = vld [vmem:[%s1258_s14 + $0x8] sm:$0xff]  ;;  %vm654_vm2 = vcmask 1042434   ;;  %vm656_vm3 = vcmask 1043459   ;;  %s785_s6 = sshll.u32 %s1254_s24, 3 }
  0x33   : > { %v830_v5 = vld [vmem:[%s1258_s14 + $0x18] sm:$0xff]  ;;  %v354_v6 = vld [vmem:[#allocation7 + $0x18] sm:$0xff]  ;;  %v353_v7 = vld [vmem:[#allocation7 + $0x10] sm:$0xff]  ;;  %vm658_vm4 = vcmask 1044484   ;;  %s823_s7 = sshll.u32 %s1173_s19, 3  ;;  %vm660_vm5 = vcmask 1045509  }
  0x34   : > { %391 = vmatpush.msra.mxu1 %v354_v6  ;;  %835 = vmatpush.msra.mxu3 %v354_v6  ;;  %v352_v8 = vld [vmem:[#allocation7 + $0x8] sm:$0xff]  ;;  %v351_v9 = vld [vmem:[#allocation7] sm:$0xff]  ;;  %v910_v10 = vld [vmem:[%s1388_s2] ss:$0 sm:$0xff]  ;;  %s679_s10 = scalar_lea.hbm %s1390_s4, %s823_s7  ;;  %vm662_vm6 = vcmask 1046534   ;;  %s250_s11 = scalar_lea.vmem [#allocation8], %s785_s6 }
  0x35   : > { %s681_s27 = sshll.u32 %s250_s11, 4  ;;  %s683_s19 = sshll.u32 %s679_s10, 4  ;;  %vm664_vm7 = vcmask 1047559   ;;  %s682_s27 = int_to_ptr.vmem [resolvable:$true] %s681_s27  ;;  %s684_s19 = int_to_ptr.hbm [resolvable:$true] %s683_s19 }
  0x36   : > { %321 = vmatpush.bf16.msra.mxu0 %v831_v1  ;;  %834 = vmatpush.bf16.msra.mxu2 %v831_v1  ;;  %s669_s25 = scalar_lea.sflag [#allocation4], %s1254_s24  ;;  %s1063_s28 = sshra.s32 %s684_s19, 4  ;;  %s1064_s28 = int_to_ptr.hbm [resolvable:$true] %s1063_s28 }
  0x37   : > { %392 = vmatpush.msra.mxu1 %v353_v7  ;;  %836 = vmatpush.msra.mxu3 %v353_v7  ;;  %s1065_s29 = scalar_lea.hbm %s1064_s28, 8  ;;  %s1069_s13 = scalar_lea.hbm %s1390_s4, 16 }
  0x38   : > { %p1066_p1 = scmp.ne.s32.totalorder %s1064_s28, %s1065_s29  ;;  %p1070_p11 = scmp.lt.s32.totalorder %s1064_s28, %s1390_s4 }
  0x39   : > { %810 = vmatmul.msk.bf16.vlgmr.msra.gmra.mxu0 %vm301_vm0, %v827_v2  ;;  %812 = vmatmul.msk.bf16.vlgmr.msra.gmra.mxu2 %vm301_vm0, %v829_v3  ;;  %p1071_p9 = scmp.lt.s32.totalorder %s1069_s13, %s1065_s29 }
  0x3a   : > { %393 = vmatpush.msra.mxu1 %v352_v8  ;;  %837 = vmatpush.msra.mxu3 %v352_v8  ;;  %p1067_p4 = pnand %p1066_p1, %p1224_p5 }
  0x3b   : > { %p1072_p2 = por %p1071_p9, %p1070_p11 }
  0x3c   : > { %394 = vmatpush.msra.mxu1 %v351_v9  ;;  %838 = vmatpush.msra.mxu3 %v351_v9  ;;  %p1068_p8 = pneg %p1067_p4 }
  0x3e   : > { %p1073_p10 = pnand %p1072_p2, %p1068_p8 }
  0x49   : > { %811 = vmatmul.msk.bf16.gmra.mxu0 %vm301_vm0, %v828_v4  ;;  %813 = vmatmul.msk.bf16.gmra.mxu2 %vm301_vm0, %v830_v5 }
  0xb6   : > { %v323_v11 = vpop.f32.mrf.mxu0 }
  0xb7   : > { %v324_v12 = vadd.f32 %v910_v10, %v323_v11 }
  0xb9   : > { %911 = vtanh.f32 %v324_v12 }
  0xbc   : > { %v333_v13 = vpop.f32.mrf.mxu2 }
  0xbd   : > { %v334_v14 = vadd.f32 %v910_v10, %v333_v13 }
  0xbe   : > { %v325_v15 = vpop.f32.mrf.mxu0 }
  0xbf   : > { %v912_v16 = vpop.eup %911  ;;  %913 = vtanh.f32 %v334_v14  ;;  %v326_v17 = vadd.f32 %v910_v10, %v325_v15 }
  0xc0   : > { %814 = vmatmul.msk.f32.vlgmr.msra.gmra.mxu1 %vm301_vm0, %v912_v16 }
  0xc1   : > { %915 = vtanh.f32 %v326_v17 }
  0xc4   : > { %v335_v18 = vpop.f32.mrf.mxu2 }
  0xc5   : > { %v914_v19 = vpop.eup %913  ;;  %v336_v20 = vadd.f32 %v910_v10, %v335_v18 }
  0xc6   : > { %v328_v21 = vpop.f32.mrf.mxu0  ;;  %818 = vmatmul.msk.f32.vlgmr.msra.gmra.mxu3 %vm301_vm0, %v914_v19 }
  0xc7   : > { %v916_v22 = vpop.eup %915  ;;  %917 = vtanh.f32 %v336_v20  ;;  %v329_v23 = vadd.f32 %v910_v10, %v328_v21 }
  0xc8   : > { %815 = vmatmul.msk.f32.gmra.mxu1 %vm301_vm0, %v916_v22 }
  0xc9   : > { %919 = vtanh.f32 %v329_v23 }
  0xcc   : > { %v338_v24 = vpop.f32.mrf.mxu2 }
  0xcd   : > { %v918_v25 = vpop.eup %917  ;;  %v339_v26 = vadd.f32 %v910_v10, %v338_v24 }
  0xce   : > { %v330_v27 = vpop.f32.mrf.mxu0  ;;  %819 = vmatmul.msk.f32.gmra.mxu3 %vm301_vm0, %v918_v25 }
  0xcf   : > { %v920_v28 = vpop.eup %919  ;;  %921 = vtanh.f32 %v339_v26  ;;  %v331_v29 = vadd.f32 %v910_v10, %v330_v27 }
  0xd0   : > { %816 = vmatmul.msk.f32.gmra.mxu1 %vm301_vm0, %v920_v28 }
  0xd1   : > { %923 = vtanh.f32 %v331_v29 }
  0xd4   : > { %v340_v30 = vpop.f32.mrf.mxu2 }
  0xd5   : > { %v922_v31 = vpop.eup %921  ;;  %v341_v32 = vadd.f32 %v910_v10, %v340_v30 }
  0xd6   : > { %820 = vmatmul.msk.f32.gmra.mxu3 %vm301_vm0, %v922_v31 }
  0xd7   : > { %v924_v33 = vpop.eup %923  ;;  %925 = vtanh.f32 %v341_v32 }
  0xd8   : > { %817 = vmatmul.msk.f32.gmra.mxu1 %vm301_vm0, %v924_v33 }
  0xdd   : > { %v926_v34 = vpop.eup %925 }
  0xde   : > { %821 = vmatmul.msk.f32.gmra.mxu3 %vm301_vm0, %v926_v34 }
 0x13d   : > { %v396_v35 = vpop.f32.mrf.mxu1 }
 0x13e   : > { %v420_v36 = vsel %vm301_vm0, %v396_v35, -inf }
 0x13f   : > { %v421_v37 = vrot.slane %v420_v36, 4 }
 0x141   : > { %v422_v38 = vmax.f32 %v420_v36, %v421_v37 }
 0x143   : > { %v423_v39 = vrot.slane %v422_v38, 2 }
 0x145   : > { %v424_v40 = vmax.f32 %v422_v38, %v423_v39  ;;  %v399_v41 = vpop.f32.mrf.mxu1 }
 0x146   : > { %v427_v42 = vsel %vm301_vm0, %v399_v41, -inf }
 0x147   : > { %v425_v43 = vrot.slane %v424_v40, 1  ;;  %v428_v44 = vrot.slane %v427_v42, 4 }
 0x149   : > { %v426_v45 = vmax.f32 %v424_v40, %v425_v43  ;;  %v429_v46 = vmax.f32 %v427_v42, %v428_v44  ;;  %v408_v47 = vpop.f32.mrf.mxu3 }
 0x14a   : > { %v448_v48 = vsel %vm301_vm0, %v408_v47, -inf }
 0x14b   : > { %v476_v49 = vsub.f32 %v396_v35, %v426_v45  ;;  %v430_v50 = vrot.slane %v429_v46, 2  ;;  %v449_v51 = vrot.slane %v448_v48, 4 }
 0x14d   : > { %v484_v52 = vmul.f32 1.442695, %v476_v49  ;;  %v431_v53 = vmax.f32 %v429_v46, %v430_v50  ;;  %v450_v54 = vmax.f32 %v448_v48, %v449_v51  ;;  %v402_v55 = vpop.f32.mrf.mxu1 }
 0x14e   : > { %v434_v56 = vsel %vm301_vm0, %v402_v55, -inf }
 0x14f   : > { %927 = vpow2.f32 %v484_v52  ;;  %v432_v57 = vrot.slane %v431_v53, 1  ;;  %v451_v58 = vrot.slane %v450_v54, 2  ;;  %v435_v59 = vrot.slane %v434_v56, 4 }
 0x151   : > { %v433_v60 = vmax.f32 %v431_v53, %v432_v57  ;;  %v452_v61 = vmax.f32 %v450_v54, %v451_v58  ;;  %v436_v62 = vmax.f32 %v434_v56, %v435_v59  ;;  %v411_v63 = vpop.f32.mrf.mxu3 }
 0x152   : > { %v455_v0 = vsel %vm301_vm0, %v411_v63, -inf }
 0x153   : > { %v477_v1 = vsub.f32 %v399_v41, %v433_v60  ;;  %v453_v2 = vrot.slane %v452_v61, 1  ;;  %v437_v3 = vrot.slane %v436_v62, 2  ;;  %v456_v4 = vrot.slane %v455_v0, 4 }
 0x155   : > { %v1292_v5 = vpop.eup %927  ;;  %v486_v6 = vmul.f32 1.442695, %v477_v1  ;;  %v454_v7 = vmax.f32 %v452_v61, %v453_v2  ;;  %v438_v8 = vmax.f32 %v436_v62, %v437_v3  ;;  %v457_v9 = vmax.f32 %v455_v0, %v456_v4  ;;  %v405_v10 = vpop.f32.mrf.mxu1 }
 0x156   : > { %v500_v11 = vsel %vm301_vm0, %v1292_v5, 0.0  ;;  %v441_v12 = vsel %vm301_vm0, %v405_v10, -inf }
 0x157   : > { %v501_v13 = vrot.slane %v500_v11, 4  ;;  %929 = vpow2.f32 %v486_v6  ;;  %v480_v14 = vsub.f32 %v408_v47, %v454_v7  ;;  %v439_v15 = vrot.slane %v438_v8, 1 }
 0x158   : > { %v458_v16 = vrot.slane %v457_v9, 2  ;;  %v442_v17 = vrot.slane %v441_v12, 4 }
 0x159   : > { %v502_v18 = vadd.f32 %v501_v13, %v500_v11  ;;  %v492_v19 = vmul.f32 1.442695, %v480_v14  ;;  %v440_v20 = vmax.f32 %v438_v8, %v439_v15  ;;  %v414_v21 = vpop.f32.mrf.mxu3 }
 0x15a   : > { %v459_v22 = vmax.f32 %v457_v9, %v458_v16  ;;  %v443_v23 = vmax.f32 %v441_v12, %v442_v17  ;;  %v462_v24 = vsel %vm301_vm0, %v414_v21, -inf }
 0x15b   : > { %931 = vpow2.f32 %v492_v19  ;;  %v478_v25 = vsub.f32 %v402_v55, %v440_v20  ;;  %v463_v26 = vrot.slane %v462_v24, 4  ;;  %v503_v30 = vrot.slane %v502_v18, 2 }
 0x15c   : > { %v460_v27 = vrot.slane %v459_v22, 1  ;;  %v444_v28 = vrot.slane %v443_v23, 2 }
 0x15d   : > { %v1298_v29 = vpop.eup %929  ;;  %v488_v31 = vmul.f32 1.442695, %v478_v25  ;;  %v464_v32 = vmax.f32 %v462_v24, %v463_v26  ;;  %v504_v41 = vadd.f32 %v503_v30, %v502_v18 }
 0x15e   : > { %v507_v33 = vsel %vm301_vm0, %v1298_v29, 0.0  ;;  %v461_v34 = vmax.f32 %v459_v22, %v460_v27  ;;  %v445_v35 = vmax.f32 %v443_v23, %v444_v28 }
 0x15f   : > { %v508_v36 = vrot.slane %v507_v33, 4  ;;  %933 = vpow2.f32 %v488_v31  ;;  %v465_v39 = vrot.slane %v464_v32, 2  ;;  %v505_v57 = vrot.slane %v504_v41, 1 }
 0x160   : > { %v481_v37 = vsub.f32 %v411_v63, %v461_v34  ;;  %v446_v38 = vrot.slane %v445_v35, 1  ;;  %v253_v34 = vld [vmem:[%s1258_s14] sm:$0xff]  }
 0x161   : > { %v1302_v40 = vpop.eup %931  ;;  %v509_v42 = vadd.f32 %v508_v36, %v507_v33  ;;  %v1304_v43 = vpop.f32.mrf.mxu3  ;;  %v466_v47 = vmax.f32 %v464_v32, %v465_v39  ;;  %v506_v7 = vadd.f32 %v505_v57, %v504_v41  ;;  %v573_v39 = vunpack.c.h.bf16 %v253_v34  ;;  %v255_v41 = vld [vmem:[%s1258_s14 + $0x8] sm:$0xff]  }
 0x162   : > { %v528_v44 = vsel %vm301_vm0, %v1302_v40, 0.0  ;;  %v494_v45 = vmul.f32 1.442695, %v481_v37  ;;  %v447_v46 = vmax.f32 %v445_v35, %v446_v38  ;;  %v469_v52 = vsel %vm301_vm0, %v1304_v43, -inf }
 0x163   : > { %v510_v48 = vrot.slane %v509_v42, 2  ;;  %v529_v49 = vrot.slane %v528_v44, 4  ;;  %v467_v51 = vrot.slane %v466_v47, 1  ;;  %v470_v56 = vrot.slane %v469_v52, 4 }
 0x164   : > { %935 = vpow2.f32 %v494_v45  ;;  %v479_v50 = vsub.f32 %v405_v10, %v447_v46 }
 0x165   : > { %v1310_v53 = vpop.eup %933  ;;  %v511_v54 = vadd.f32 %v510_v48, %v509_v42  ;;  %v530_v55 = vadd.f32 %v529_v49, %v528_v44  ;;  %v468_v60 = vmax.f32 %v466_v47, %v467_v51  ;;  %v471_v0 = vmax.f32 %v469_v52, %v470_v56 }
 0x166   : > { %v514_v58 = vsel %vm301_vm0, %v1310_v53, 0.0  ;;  %v490_v59 = vmul.f32 1.442695, %v479_v50  ;;  %v574_v49 = vunpack.c.l.bf16 %v255_v41 }
 0x167   : > { %v512_v61 = vrot.slane %v511_v54, 1  ;;  %v531_v62 = vrot.slane %v530_v55, 2  ;;  %v515_v63 = vrot.slane %v514_v58, 4  ;;  %v482_v1 = vsub.f32 %v414_v21, %v468_v60 }
 0x168   : > { %937 = vpow2.f32 %v490_v59  ;;  %v472_v9 = vrot.slane %v471_v0, 2 }
 0x169   : > { %v513_v2 = vadd.f32 %v512_v61, %v511_v54  ;;  %v532_v3 = vadd.f32 %v531_v62, %v530_v55  ;;  %v516_v4 = vadd.f32 %v515_v63, %v514_v58  ;;  %v496_v8 = vmul.f32 1.442695, %v482_v1  ;;  %v257_v54 = vld [vmem:[%s1258_s14 + $0x10] sm:$0xff]  }
 0x16a   : > { %v1314_v6 = vpop.eup %935  ;;  %v473_v14 = vmax.f32 %v471_v0, %v472_v9  ;;  %v576_v60 = vunpack.c.l.bf16 %v257_v54 }
 0x16b   : > { %939 = vrcp.f32 %v513_v2  ;;  %v533_v10 = vrot.slane %v532_v3, 1  ;;  %v517_v11 = vrot.slane %v516_v4, 2  ;;  %v535_v12 = vsel %vm301_vm0, %v1314_v6, 0.0 }
 0x16c   : > { %v536_v13 = vrot.slane %v535_v12, 4  ;;  %941 = vpow2.f32 %v496_v8  ;;  %v474_v19 = vrot.slane %v473_v14, 1 }
 0x16d   : > { %v518_v15 = vadd.f32 %v517_v11, %v516_v4  ;;  %943 = vrcp.f32 %v506_v7  ;;  %v534_v17 = vadd.f32 %v533_v10, %v532_v3  ;;  %v575_v11 = vunpack.c.h.bf16 %v255_v41 }
 0x16e   : > { %v1318_v16 = vpop.eup %937  ;;  %v537_v18 = vadd.f32 %v536_v13, %v535_v12  ;;  %v475_v24 = vmax.f32 %v473_v14, %v474_v19 }
 0x16f   : > { %v519_v20 = vrot.slane %v518_v15, 1  ;;  %v521_v21 = vsel %vm301_vm0, %v1318_v16, 0.0  ;;  %945 = vrcp.f32 %v534_v17 }
 0x170   : > { %v538_v22 = vrot.slane %v537_v18, 2  ;;  %v522_v23 = vrot.slane %v521_v21, 4  ;;  %v483_v31 = vsub.f32 %v1304_v43, %v475_v24  ;;  %v572_v43 = vunpack.c.l.bf16 %v253_v34 }
 0x171   : > { %v940_v25 = vpop.eup %939  ;;  %v520_v26 = vadd.f32 %v519_v20, %v518_v15  ;;  %v259_v20 = vld [vmem:[%s1258_s14 + $0x18] sm:$0xff]  }
 0x172   : > { %v1322_v27 = vpop.eup %941  ;;  %v539_v28 = vadd.f32 %v538_v22, %v537_v18  ;;  %v523_v30 = vadd.f32 %v522_v23, %v521_v21  ;;  %v565_v38 = vmul.f32 %v940_v25, %v1298_v29  ;;  %v498_v42 = vmul.f32 1.442695, %v483_v31 }
 0x173   : > { %947 = vrcp.f32 %v520_v26  ;;  %v542_v32 = vsel %vm301_vm0, %v1322_v27, 0.0  ;;  %v944_v33 = vpop.eup %943 }
 0x174   : > { %v540_v35 = vrot.slane %v539_v28, 1  ;;  %v524_v36 = vrot.slane %v523_v30, 2  ;;  %v543_v37 = vrot.slane %v542_v32, 4  ;;  %v564_v46 = vmul.f32 %v944_v33, %v1292_v5 }
 0x175   : > { %949 = vpow2.f32 %v498_v42  ;;  %v946_v48 = vpop.eup %945  ;;  %v581_v52 = vmul.f32 %v573_v39, %v565_v38 }
 0x176   : > { %v541_v44 = vadd.f32 %v540_v35, %v539_v28  ;;  %v525_v45 = vadd.f32 %v524_v36, %v523_v30  ;;  %v544_v47 = vadd.f32 %v543_v37, %v542_v32  ;;  %v580_v57 = vmul.f32 %v572_v43, %v564_v46 }
 0x177   : > { %v568_v59 = vmul.f32 %v946_v48, %v1302_v40  ;;  %v595_v62 = vsel %vm301_vm0, %v581_v52, 0.0  ;;  %v577_v40 = vunpack.c.h.bf16 %v257_v54  ;;  %v578_v30 = vunpack.c.l.bf16 %v259_v20 }
 0x178   : > { %951 = vrcp.f32 %v541_v44  ;;  %v526_v50 = vrot.slane %v525_v45, 1  ;;  %v545_v55 = vrot.slane %v544_v47, 2  ;;  %v596_v4 = vrot.slane %v595_v62, 4 }
 0x179   : > { %v948_v51 = vpop.eup %947  ;;  %v584_v7 = vmul.f32 %v576_v60, %v568_v59 }
 0x17a   : > { %v566_v29 = vmul.f32 %v948_v51, %v1310_v53  ;;  %v527_v56 = vadd.f32 %v526_v50, %v525_v45  ;;  %v546_v58 = vadd.f32 %v545_v55, %v544_v47  ;;  %v588_v53 = vsel %vm301_vm0, %v580_v57, 0.0 }
 0x17b   : > { %v1334_v61 = vpop.eup %949  ;;  %v589_v13 = vrot.slane %v588_v53, 4  ;;  %v597_v18 = vadd.f32 %v596_v4, %v595_v62  ;;  %v616_v19 = vsel %vm301_vm0, %v584_v7, 0.0  ;;  %v579_v55 = vunpack.c.h.bf16 %v259_v20 }
 0x17c   : > { %v582_v5 = vmul.f32 %v574_v49, %v566_v29  ;;  %953 = vrcp.f32 %v527_v56  ;;  %v547_v63 = vrot.slane %v546_v58, 1  ;;  %v549_v2 = vsel %vm301_vm0, %v1334_v61, 0.0 }
 0x17d   : > { %v550_v9 = vrot.slane %v549_v2, 4  ;;  %v590_v23 = vadd.f32 %v589_v13, %v588_v53  ;;  %v617_v25 = vrot.slane %v616_v19, 4  ;;  %v598_v32 = vrot.slane %v597_v18, 2 }
 0x17e   : > { %v952_v0 = vpop.eup %951  ;;  %v602_v1 = vsel %vm301_vm0, %v582_v5, 0.0  ;;  %v548_v8 = vadd.f32 %v547_v63, %v546_v58 }
 0x17f   : > { %v569_v3 = vmul.f32 %v952_v0, %v1314_v6  ;;  %v603_v10 = vrot.slane %v602_v1, 4  ;;  %v551_v14 = vadd.f32 %v550_v9, %v549_v2  ;;  %v591_v36 = vrot.slane %v590_v23, 2 }
 0x180   : > { %955 = vrcp.f32 %v548_v8  ;;  %v618_v41 = vadd.f32 %v617_v25, %v616_v19  ;;  %v599_v44 = vadd.f32 %v598_v32, %v597_v18 }
 0x181   : > { %v585_v15 = vmul.f32 %v577_v40, %v569_v3  ;;  %v552_v6 = vrot.slane %v551_v14, 2  ;;  %v604_v21 = vadd.f32 %v603_v10, %v602_v1  ;;  %v592_v47 = vadd.f32 %v591_v36, %v590_v23 }
 0x182   : > { %v954_v12 = vpop.eup %953  ;;  %v619_v51 = vrot.slane %v618_v41, 2  ;;  %v600_v52 = vrot.slane %v599_v44, 1 }
 0x183   : > { %v567_v17 = vmul.f32 %v954_v12, %v1318_v16  ;;  %v553_v24 = vadd.f32 %v552_v6, %v551_v14  ;;  %v623_v26 = vsel %vm301_vm0, %v585_v15, 0.0  ;;  %v605_v16 = vrot.slane %v604_v21, 2 }
 0x184   : > { %v624_v37 = vrot.slane %v623_v26, 4  ;;  %v593_v56 = vrot.slane %v592_v47, 1  ;;  %v620_v59 = vadd.f32 %v619_v51, %v618_v41  ;;  %v601_v62 = vadd.f32 %v600_v52, %v599_v44 }
 0x185   : > { %v583_v22 = vmul.f32 %v575_v11, %v567_v17  ;;  %v554_v34 = vrot.slane %v553_v24, 1  ;;  %v606_v46 = vadd.f32 %v605_v16, %v604_v21 }
 0x186   : > { %v956_v31 = vpop.eup %955  ;;  %v625_v48 = vadd.f32 %v624_v37, %v623_v26  ;;  %v594_v1 = vadd.f32 %v593_v56, %v592_v47  ;;  %v621_v3 = vrot.slane %v620_v59, 1 }
 0x187   : > { %v609_v28 = vsel %vm301_vm0, %v583_v22, 0.0  ;;  %v570_v35 = vmul.f32 %v956_v31, %v1322_v27  ;;  %v555_v39 = vadd.f32 %v554_v34, %v553_v24  ;;  %v607_v27 = vrot.slane %v606_v46, 1 }
 0x188   : > { %v610_v33 = vrot.slane %v609_v28, 4  ;;  %v626_v57 = vrot.slane %v625_v48, 2  ;;  %v653_v8 = vsel %vm652_vm1, %v601_v62, %v594_v1  ;;  %v622_v12 = vadd.f32 %v621_v3, %v620_v59 }
 0x189   : > { %v586_v42 = vmul.f32 %v578_v30, %v570_v35  ;;  %957 = vrcp.f32 %v555_v39  ;;  %v608_v63 = vadd.f32 %v607_v27, %v606_v46 }
 0x18a   : > { %v611_v38 = vadd.f32 %v610_v33, %v609_v28  ;;  %v627_v2 = vadd.f32 %v626_v57, %v625_v48 }
 0x18b   : > { %v630_v43 = vsel %vm301_vm0, %v586_v42, 0.0  ;;  %v655_v9 = vsel %vm654_vm2, %v608_v63, %v653_v8 }
 0x18c   : > { %v612_v45 = vrot.slane %v611_v38, 2  ;;  %v631_v50 = vrot.slane %v630_v43, 4  ;;  %v628_v10 = vrot.slane %v627_v2, 1 }
 0x18e   : > { %v613_v49 = vadd.f32 %v612_v45, %v611_v38  ;;  %v632_v54 = vadd.f32 %v631_v50, %v630_v43  ;;  %v629_v18 = vadd.f32 %v628_v10, %v627_v2 }
 0x18f   : > { %v958_v29 = vpop.eup %957 }
 0x190   : > { %v614_v58 = vrot.slane %v613_v49, 1  ;;  %v633_v60 = vrot.slane %v632_v54, 2  ;;  %v571_v5 = vmul.f32 %v958_v29, %v1334_v61 }
 0x192   : > { %v587_v0 = vmul.f32 %v579_v55, %v571_v5  ;;  %v615_v53 = vadd.f32 %v614_v58, %v613_v49  ;;  %v634_v40 = vadd.f32 %v633_v60, %v632_v54 }
 0x194   : > { %v637_v4 = vsel %vm301_vm0, %v587_v0, 0.0  ;;  %v657_v11 = vsel %vm656_vm3, %v615_v53, %v655_v9  ;;  %v635_v13 = vrot.slane %v634_v40, 1 }
 0x195   : > { %v638_v7 = vrot.slane %v637_v4, 4  ;;  %v659_v15 = vsel %vm658_vm4, %v622_v12, %v657_v11 }
 0x196   : > { %v636_v19 = vadd.f32 %v635_v13, %v634_v40  ;;  %v661_v6 = vsel %vm660_vm5, %v629_v18, %v659_v15 }
 0x197   : > { %v639_v61 = vadd.f32 %v638_v7, %v637_v4 }
 0x198   : > { %v663_v22 = vsel %vm662_vm6, %v636_v19, %v661_v6 }
 0x199   : > { %v640_v14 = vrot.slane %v639_v61, 2 }
 0x19b   : > { %v641_v17 = vadd.f32 %v640_v14, %v639_v61 }
 0x19d   : > { %v642_v20 = vrot.slane %v641_v17, 1 }
 0x19f   : > { %v643_v21 = vadd.f32 %v642_v20, %v641_v17 }
 0x1a1   : > { %v665_v23 = vsel %vm664_vm7, %v643_v21, %v663_v22 }
 0x1a2   : > { %667 = vst.msk [vmem:[%s250_s11] sm:$0xff] %vm301_vm0, %v665_v23 }
 0x1a3   : > { %1076 = shalt.err (!%p1073_p10)
}
 0x1a4   : > { %849 = dma.vmem_to_hbm [thread:$0]  (%p1224_p5), %s682_s27, 128, %s684_s19, %s669_s25  }
 0x1a5 PF: > { %s695_s24 = sand.u32 1, %s1107_s15   ;;  %p1396_p12 = scmp.ge.s32.totalorder %s1119_s18, 2 }
 0x1a6   : > { %s696_s26 = scalar_lea.sflag [#allocation4], %s695_s24 }
 0x1a7   : > { %p863_p13 = pnand %p1396_p12, %p1187_p6 }
 0x1a9   : > { %p864_p0 = pneg %p863_p13 }
 0x1ab   : > { %1102 = dma.done.wait (%p864_p0), %s696_s26, 128  }
 0x1ac   : > { %1104 = vsyncadd (%p864_p0), %s696_s26, 4294967168  ;;  %p18_p3 = scmp.ge.s32.totalorder %s1211_s12, 4   ;;  %s1397_s15 = smov %s1111_s16 }
 0x1ad   : > { %s1398_s16 = smov %s1115_s17  ;;  %s1399_s17 = smov %s1220_s20 }
 0x1ae   : > { %s1400_s18 = smov %s1211_s12  ;;  %20 = sbr.rel (!%p18_p3) target bundleno = 6 (0x6), region = 89 }
 0x1b3   :  { %702 = vsyncpa [#allocation3], 1 }
 0x1b4   :  { %704 = vsyncpa [#allocation3 + $0x1], 1 }
 0x1b5   :  { %705 = vsyncpa [#allocation6], 1 }
 0x1b6   :  { %706 = vsyncpa [#allocation4], 1 }
 0x1b7   :  { %708 = vsyncpa [#allocation4 + $0x1], 1 }

</bundles_post_ra>
